<compile_context>
chip_gen: v5e
topology: v5e:2x2
jax: 0.10.0
libtpu: 0.0.40
codegen_flags: <defaults>
</compile_context>

<pallas_src>
import functools

import numpy as np
import jax
import jax.numpy as jnp
from jax.experimental import pallas as pl
from jax.experimental.pallas import tpu as pltpu


def _round_up(x, m):
    return ((x + m - 1) // m) * m


def _vmem_capacity_bytes():
    try:
        info = pltpu.get_tpu_info()
        for attr in ("vmem_capacity_bytes", "vmem_bytes", "vmem_size_bytes"):
            val = getattr(info, attr, None)
            if val:
                return int(val)
    except Exception:
        pass
    return 64 << 20  # conservative fallback (v7x per-TC VMEM)


def _estimate_vmem_bytes(C, D, tile_p, n_chunks, K):
    f = 4  # f32
    imgr_res = 2 * n_chunks * C * K * f              # chunked imgR (double-buffered)
    tiles = 2 * (C + 3 * D) * tile_p * f             # imgL + u + v + out blocks
    temps = (K * tile_p + 2 * C * tile_p + 4 * tile_p) * f   # hat + sampled + rows
    return imgr_res + tiles + temps


def _pick_tile_p(P_pad, requested, C, D, n_chunks, K, budget):
    if requested is not None and requested % 128 == 0 and P_pad % requested == 0:
        return int(requested)
    for cand in (1024, 512, 256, 128):
        if P_pad % cand == 0 and _estimate_vmem_bytes(C, D, cand, n_chunks, K) <= budget:
            return cand
    for cand in (128, 256, 512, 1024):
        if P_pad % cand == 0:
            return cand
    return P_pad


# ----------------------------------------------------------------------------
# Pallas kernel: separable-hat bilinear epipolar sampling + per-pixel dot
# ----------------------------------------------------------------------------
def _epipolar_corr_kernel(cmin_ref, cmax_ref, imgL_ref, imgR_ref, u_ref, v_ref,
                          out_ref, *, W, R, n_tiles):
    # Blocks: imgL (1, C, Pt); imgR (1, n_chunks, C, K) full-resident per batch
    # (K = R*W source pixels = R whole image rows per chunk); u/v/out (1, D, Pt).
    C = imgL_ref.shape[1]
    Pt = imgL_ref.shape[2]
    D = u_ref.shape[1]
    K = imgR_ref.shape[3]

    b = pl.program_id(0)
    t = pl.program_id(1)
    lin = b * n_tiles + t
    g_lo = cmin_ref[lin]          # first source chunk touched by this tile
    g_hi = cmax_ref[lin]          # last source chunk touched (inclusive)

    inv_c = jnp.float32(1.0 / C)

    # Chunk-local source coordinates, division-free (a chunk is R whole rows):
    #   row = #{j in [1, R) : sid >= j*W},  col = sid - row*W.
    sid = jax.lax.broadcasted_iota(jnp.int32, (K, 1), 0)
    row_in_chunk = jnp.zeros((K, 1), jnp.int32)
    for j in range(1, R):
        row_in_chunk = row_in_chunk + (sid >= j * W).astype(jnp.int32)
    xs = (sid - row_in_chunk * W).astype(jnp.float32)        # (K, 1) in [0, W)
    ys_rel = row_in_chunk.astype(jnp.float32)                # (K, 1) in [0, R)

    # TODO(synk): the hat weights are separable in x/y; computing the two
    # factors at (W,Pt)/(R,Pt) and contracting per-row would cut the remaining
    # VALU work further.  Also bf16 hat/imgR operands (f32 accumulation) would
    # roughly double VPU/MXU density on v6e/v7x; kept f32 for exactness here.
    def d_body(d, carry):
        u_d = u_ref[0, pl.ds(d, 1), :]                       # (1, Pt)
        v_d = v_ref[0, pl.ds(d, 1), :]                       # (1, Pt)

        def chunk_body(g, row_acc):
            ys = ys_rel + (g * R).astype(jnp.float32)        # (K, 1)
            # Separable bilinear "hat" weights; exactly reproduces
            # F.grid_sample(..., mode='bilinear', padding_mode='zeros').
            hat = (jnp.maximum(1.0 - jnp.abs(xs - u_d), 0.0) *
                   jnp.maximum(1.0 - jnp.abs(ys - v_d), 0.0))        # (K, Pt)
            imgR_chunk = imgR_ref[0, g]                              # (C, K)
            sampled = jax.lax.dot_general(
                imgR_chunk, hat, (((1,), (0,)), ((), ())),
                preferred_element_type=jnp.float32)                  # (C, Pt)
            return row_acc + jnp.sum(imgL_ref[0] * sampled, axis=0,
                                     keepdims=True)

        row = jax.lax.fori_loop(g_lo, g_hi + 1, chunk_body,
                                jnp.zeros((1, Pt), jnp.float32))
        out_ref[0, pl.ds(d, 1), :] = row * inv_c             # lane-dense row
        return carry

    jax.lax.fori_loop(0, D, d_body, 0)


def pallas_epipolar_correlation(imgL, imgR, u, v, tile_p=None, src_rows=None):
    """imgL/imgR: (B, C, H, W); u/v: (B, D, H*W) input-pixel sample coords.
    Returns (B, D, H*W) = mean over channels of imgL * bilinear_sample(imgR)."""
    B, C, H, W = imgL.shape
    P = H * W
    D = u.shape[1]

    imgL = imgL.astype(jnp.float32)
    imgR = imgR.astype(jnp.float32)
    u = u.astype(jnp.float32)
    v = v.astype(jnp.float32)

    # --- source chunking: R whole image rows per chunk (target K ~= 256) -----
    R = int(src_rows) if src_rows else max(1, -(-256 // W))
    H_pad = _round_up(H, R)
    n_chunks = H_pad // R
    K = R * W
    imgR_p = imgR if H_pad == H else jnp.pad(
        imgR, ((0, 0), (0, 0), (0, H_pad - H), (0, 0)))      # zero rows -> zero contribution
    imgR_chunks = jnp.transpose(
        imgR_p.reshape(B, C, n_chunks, K), (0, 2, 1, 3))     # (B, n_chunks, C, K)
    # TODO(synk): for very large C*P (v7x 64 MiB/TC), switch imgR to
    # memory_space=pl.ANY and manually double-buffer only the pruned chunks.

    # --- output-pixel padding / per-chip tile selection (lane-dense) ---------
    P_pad = _round_up(P, 128)
    vmem_cap = _vmem_capacity_bytes()
    tile_p = _pick_tile_p(P_pad, tile_p, C, D, n_chunks, K,
                          budget=int(0.45 * vmem_cap))
    n_tiles = P_pad // tile_p

    imgL_flat = imgL.reshape(B, C, P)
    if P_pad != P:
        pads = ((0, 0), (0, 0), (0, P_pad - P))
        imgL_flat = jnp.pad(imgL_flat, pads)
        # Far out-of-bounds coords -> zero hat weights on padded output pixels.
        u = jnp.pad(u, pads, constant_values=-2.0)
        v = jnp.pad(v, pads, constant_values=-2.0)

    # --- data-dependent chunk pruning (scalar prefetch, review item 2) -------
    # Sources with nonzero hat weight for a sample v lie in rows
    # [floor(v), floor(v)+1]; take the per-(batch, tile) union over all D.
    v_t = v.reshape(B, D, n_tiles, tile_p)
    vc = jnp.clip(v_t, -1.0, float(H))
    y_lo = jnp.clip(jnp.floor(jnp.min(vc, axis=(1, 3))), 0.0, float(H - 1))
    y_hi = jnp.clip(jnp.floor(jnp.max(vc, axis=(1, 3))) + 1.0, 0.0, float(H - 1))
    cmin = (y_lo.astype(jnp.int32) // R).reshape(B * n_tiles)
    cmax = (y_hi.astype(jnp.int32) // R).reshape(B * n_tiles)

    est = _estimate_vmem_bytes(C, D, tile_p, n_chunks, K)
    vmem_limit = max(32 << 20, est + (16 << 20))
    vmem_limit = int(min(vmem_limit, max(32 << 20, vmem_cap - (4 << 20))))

    kernel = functools.partial(_epipolar_corr_kernel, W=W, R=R, n_tiles=n_tiles)
    out = pl.pallas_call(
        kernel,
        out_shape=jax.ShapeDtypeStruct((B, D, P_pad), jnp.float32),
        grid_spec=pltpu.PrefetchScalarGridSpec(
            num_scalar_prefetch=2,
            grid=(B, n_tiles),
            in_specs=[
                pl.BlockSpec((1, C, tile_p), lambda b, t, cl, ch: (b, 0, t)),
                # Chunked imgR stays resident per batch: its block index ignores
                # the pixel-tile axis, so it is DMA'd once per batch and the
                # kernel only reads the pruned chunks out of it.
                pl.BlockSpec((1, n_chunks, C, K),
                             lambda b, t, cl, ch: (b, 0, 0, 0)),
                pl.BlockSpec((1, D, tile_p), lambda b, t, cl, ch: (b, 0, t)),
                pl.BlockSpec((1, D, tile_p), lambda b, t, cl, ch: (b, 0, t)),
            ],
            out_specs=pl.BlockSpec((1, D, tile_p),
                                   lambda b, t, cl, ch: (b, 0, t)),
        ),
        compiler_params=pltpu.CompilerParams(
            dimension_semantics=("parallel", "parallel"),
            vmem_limit_bytes=vmem_limit),
    )(cmin, cmax, imgL_flat, imgR_chunks, u, v)
    return out[:, :, :P]


# ----------------------------------------------------------------------------
# Module (geometry glue in plain JAX, correlation in Pallas)
# ----------------------------------------------------------------------------
class EpipolarCorrelationLayer:
    def __init__(self, maxd, mind, H, W, tile_p=None, src_rows=None):
        self.maxd = list(maxd)
        self.mind = list(mind)
        self.out = len(self.maxd) * len(self.mind)
        self.H = H
        self.W = W
        self.tile_p = tile_p
        self.src_rows = src_rows
        K = np.zeros((3, 3))
        K[0, 0] = 0.89115971 * self.W
        K[0, 2] = 0.5 * self.W
        K[1, 1] = 1.18821287 * self.H
        K[1, 2] = 0.5 * self.H
        K[2, 2] = 1.0
        Ki = np.linalg.inv(K)
        pixel_dir = np.zeros((self.H, self.W, 3))
        for i in range(self.H):
            for j in range(self.W):
                pixel_dir[i, j, :] = np.dot(Ki, np.array([j, i, 1]))
        pixel_dir = pixel_dir.reshape(self.H * self.W, 3, 1).astype(np.float32)
        pixel_loc = np.zeros((self.H, self.W, 2))
        for i in range(self.H):
            for j in range(self.W):
                pixel_loc[i, j, :] = [j, i]
        pixel_loc = pixel_loc.reshape(1, self.H, self.W, 2).astype(np.float32)
        self.K = jnp.asarray(K.reshape(1, 3, 3).astype(np.float32))
        self.Ki = jnp.asarray(Ki.reshape(1, 3, 3).astype(np.float32))
        self.pixel_dir = jnp.asarray(pixel_dir)
        self.pixel_loc = jnp.asarray(pixel_loc)

    def _geometry(self, R, T, initial_flow):
        """Returns (para_dir (B,H,W,2), initial_loc (B,H,W,2), u (B,D,P), v (B,D,P)).
        u/v are imgR input-pixel coordinates using F.grid_sample's default
        align_corners=False mapping."""
        B = R.shape[0]
        H, W = self.H, self.W

        first_part = jnp.matmul(self.K, R).reshape(B, 1, 3, 3)
        first_part = jnp.matmul(first_part, self.pixel_dir)          # (B, P, 3, 1)
        second_part = jnp.matmul(self.K, T).reshape(B, 1, 3, 1)

        fp_depth = first_part[:, :, 2:3, :]
        fp_depth = jnp.where(jnp.abs(fp_depth) < 1e-6, 1e-6, fp_depth)
        end_point = first_part[:, :, :2, :] / fp_depth               # (B, P, 2, 1)

        space_point = first_part * 10.0 + second_part
        sp_depth = space_point[:, :, 2:3, :]
        sp_depth = jnp.where(jnp.abs(sp_depth) < 1e-6, 1e-6, sp_depth)
        project_point = space_point[:, :, :2, :] / sp_depth

        diff = project_point - end_point
        norm = jnp.sqrt(jnp.sum(diff * diff, axis=2, keepdims=True))
        para_dir = diff / jnp.maximum(norm, 1e-12)                   # F.normalize(dim=2)
        perp_dir = jnp.concatenate(
            [-para_dir[:, :, 1:2, :], para_dir[:, :, 0:1, :]], axis=2)

        para_dir = para_dir.reshape(B, H, W, 2)
        perp_dir = perp_dir.reshape(B, H, W, 2)
        end_point = end_point.reshape(B, H, W, 2)

        flow_point = self.pixel_loc + jnp.transpose(initial_flow, (0, 2, 3, 1))
        nearest_k = jnp.sum((flow_point - end_point) * para_dir, axis=3, keepdims=True)
        initial_loc = end_point + nearest_k * para_dir               # (B, H, W, 2)

        # NOTE: `+ perp_i + perp_dir` reproduces the original PyTorch code
        # verbatim (likely intended as `perp_i * perp_dir`, kept for fidelity).
        grids = []
        for para_i in self.maxd:
            for perp_i in self.mind:
                grids.append(initial_loc + para_i * para_dir + perp_i + perp_dir)
        grid = jnp.stack(grids, axis=1)                              # (B, D, H, W, 2)

        # PyTorch normalizes g = 2*x/(W-1) - 1; F.grid_sample (align_corners
        # =False default) then samples input pixel ((g+1)*W - 1)/2
        # = x * W/(W-1) - 0.5 (same for H).
        P = H * W
        u = grid[..., 0].reshape(B, self.out, P) * (W / (W - 1.0)) - 0.5
        v = grid[..., 1].reshape(B, self.out, P) * (H / (H - 1.0)) - 0.5
        return para_dir, initial_loc, u, v

    def __call__(self, imgL, imgR, R, T, initial_flow):
        B, C, H, W = imgL.shape
        para_dir, initial_loc, u, v = self._geometry(R, T, initial_flow)

        corr = pallas_epipolar_correlation(
            imgL, imgR, u, v, tile_p=self.tile_p, src_rows=self.src_rows)
        corr = corr.reshape(B, self.out, H, W)                       # already /C

        para_dir_nchw = jnp.transpose(para_dir, (0, 3, 1, 2))
        initial_loc_nchw = jnp.transpose(initial_loc, (0, 3, 1, 2))
        epipolar_flow = initial_loc_nchw - jnp.transpose(self.pixel_loc, (0, 3, 1, 2))
        # TODO(synk): the PyTorch NaN-check print statements have no in-graph
        # equivalent; they are host-side diagnostics and are intentionally omitted.
        return jnp.concatenate([epipolar_flow, para_dir_nchw, corr], axis=1)


# ----------------------------------------------------------------------------
# Plain-JAX reference for the correlation hot path (for validation)
# ----------------------------------------------------------------------------
def _reference_correlation(imgL_flat, imgR_flat, u, v, H, W):
    B, C, P = imgL_flat.shape
    x0 = jnp.floor(u)
    y0 = jnp.floor(v)
    fx = u - x0
    fy = v - y0
    x0i = x0.astype(jnp.int32)
    y0i = y0.astype(jnp.int32)

    def sample(xi, yi, w):
        valid = (xi >= 0) & (xi < W) & (yi >= 0) & (yi < H)
        idx = jnp.clip(yi, 0, H - 1) * W + jnp.clip(xi, 0, W - 1)    # (B, D, P)
        idx_b = jnp.broadcast_to(idx[:, None], (B, C) + idx.shape[1:])
        vals = jnp.take_along_axis(imgR_flat[:, :, None, :], idx_b, axis=3)
        return jnp.where(valid[:, None], w[:, None], 0.0) * vals

    s = (sample(x0i, y0i, (1 - fx) * (1 - fy))
         + sample(x0i + 1, y0i, fx * (1 - fy))
         + sample(x0i, y0i + 1, (1 - fx) * fy)
         + sample(x0i + 1, y0i + 1, fx * fy))                        # (B, C, D, P)
    return jnp.sum(imgL_flat[:, :, None, :] * s, axis=1) / C         # (B, D, P)


if __name__ == "__main__":
    B, C, H, W = 2, 4, 16, 16
    maxd = [-1, 0, 1]
    mind = [-1, 0, 1]
    # Small tile / chunk sizes to exercise the (batch, pixel-tile) grid, the
    # per-tile chunk bounds and the dynamic-trip chunk loop.
    layer = EpipolarCorrelationLayer(maxd, mind, H, W, tile_p=128, src_rows=8)
    D = layer.out
    P = H * W

    key = jax.random.PRNGKey(0)
    k1, k2, k3, k4, k5 = jax.random.split(key, 5)
    imgL = jax.random.normal(k1, (B, C, H, W), jnp.float32)
    imgR = jax.random.normal(k2, (B, C, H, W), jnp.float32)
    R = jnp.eye(3, dtype=jnp.float32)[None] + 0.01 * jax.random.normal(k3, (B, 3, 3), jnp.float32)
    T = 0.2 * jax.random.normal(k4, (B, 3, 1), jnp.float32)
    initial_flow = 0.5 * jax.random.normal(k5, (B, 2, H, W), jnp.float32)

    result = layer(imgL, imgR, R, T, initial_flow)
    jax.block_until_ready(result)
    assert result.shape == (B, 2 + 2 + D, H, W), result.shape

    # Validate the Pallas correlation against a plain-JAX bilinear reference.
    _, _, u, v = layer._geometry(R, T, initial_flow)
    ref = _reference_correlation(imgL.reshape(B, C, P), imgR.reshape(B, C, P), u, v, H, W)
    got = result[:, 4:].reshape(B, D, P)
    np.testing.assert_allclose(np.asarray(got), np.asarray(ref), atol=2e-3, rtol=2e-3)

    # Also exercise the default (per-chip) tile / chunk selection path.
    layer2 = EpipolarCorrelationLayer(maxd, mind, H, W)
    result2 = layer2(imgL, imgR, R, T, initial_flow)
    jax.block_until_ready(result2)
    np.testing.assert_allclose(np.asarray(result2[:, 4:].reshape(B, D, P)),
                               np.asarray(ref), atol=2e-3, rtol=2e-3)

    print("KERNEL_OK")
</pallas_src>

<mosaic_0001>
module attributes {stable_mosaic.version = 11 : i64} {
  func.func @_epipolar_corr_kernel(%arg0: i32, %arg1: i32, %arg2: memref<4xi32, #tpu.memory_space<smem>>, %arg3: memref<4xi32, #tpu.memory_space<smem>>, %arg4: memref<1x4x128xf32, #tpu.memory_space<vmem>>, %arg5: memref<1x2x4x128xf32, #tpu.memory_space<vmem>>, %arg6: memref<1x9x128xf32, #tpu.memory_space<vmem>>, %arg7: memref<1x9x128xf32, #tpu.memory_space<vmem>>, %arg8: memref<1x9x128xf32, #tpu.memory_space<vmem>>) attributes {dimension_semantics = [#tpu.dimension_semantics<parallel>, #tpu.dimension_semantics<parallel>], iteration_bounds = array<i64: 2, 2>, scalar_prefetch = 2 : i64, scratch_operands = 0 : i64, tpu.core_type = #tpu.core_type<tc>, window_params = [{transform_indices = @transform_0, window_bounds = array<i64: 1, 4, 128>}, {transform_indices = @transform_1, window_bounds = array<i64: 1, 2, 4, 128>}, {transform_indices = @transform_2, window_bounds = array<i64: 1, 9, 128>}, {transform_indices = @transform_3, window_bounds = array<i64: 1, 9, 128>}, {transform_indices = @transform_4, window_bounds = array<i64: 1, 9, 128>}]} {
    %c2_i32 = arith.constant 2 : i32
    %0 = arith.muli %arg0, %c2_i32 : i32
    %1 = arith.addi %0, %arg1 : i32
    %2 = arith.index_cast %1 : i32 to index
    %3 = memref.load %arg2[%2] : memref<4xi32, #tpu.memory_space<smem>>
    %4 = arith.index_cast %1 : i32 to index
    %5 = memref.load %arg3[%4] : memref<4xi32, #tpu.memory_space<smem>>
    %6 = tpu.iota {dimensions = array<i32: 0>} : vector<128x1xi32>
    %c0_i32 = arith.constant 0 : i32
    %7 = vector.broadcast %c0_i32 : i32 to vector<128x1xi32>
    %c16_i32 = arith.constant 16 : i32
    %8 = vector.broadcast %c16_i32 : i32 to vector<128x1xi32>
    %9 = arith.cmpi sge, %6, %8 : vector<128x1xi32>
    %10 = arith.extui %9 : vector<128x1xi1> to vector<128x1xi32>
    %11 = arith.addi %7, %10 : vector<128x1xi32>
    %c32_i32 = arith.constant 32 : i32
    %12 = vector.broadcast %c32_i32 : i32 to vector<128x1xi32>
    %13 = arith.cmpi sge, %6, %12 : vector<128x1xi32>
    %14 = arith.extui %13 : vector<128x1xi1> to vector<128x1xi32>
    %15 = arith.addi %11, %14 : vector<128x1xi32>
    %c48_i32 = arith.constant 48 : i32
    %16 = vector.broadcast %c48_i32 : i32 to vector<128x1xi32>
    %17 = arith.cmpi sge, %6, %16 : vector<128x1xi32>
    %18 = arith.extui %17 : vector<128x1xi1> to vector<128x1xi32>
    %19 = arith.addi %15, %18 : vector<128x1xi32>
    %c64_i32 = arith.constant 64 : i32
    %20 = vector.broadcast %c64_i32 : i32 to vector<128x1xi32>
    %21 = arith.cmpi sge, %6, %20 : vector<128x1xi32>
    %22 = arith.extui %21 : vector<128x1xi1> to vector<128x1xi32>
    %23 = arith.addi %19, %22 : vector<128x1xi32>
    %c80_i32 = arith.constant 80 : i32
    %24 = vector.broadcast %c80_i32 : i32 to vector<128x1xi32>
    %25 = arith.cmpi sge, %6, %24 : vector<128x1xi32>
    %26 = arith.extui %25 : vector<128x1xi1> to vector<128x1xi32>
    %27 = arith.addi %23, %26 : vector<128x1xi32>
    %c96_i32 = arith.constant 96 : i32
    %28 = vector.broadcast %c96_i32 : i32 to vector<128x1xi32>
    %29 = arith.cmpi sge, %6, %28 : vector<128x1xi32>
    %30 = arith.extui %29 : vector<128x1xi1> to vector<128x1xi32>
    %31 = arith.addi %27, %30 : vector<128x1xi32>
    %c112_i32 = arith.constant 112 : i32
    %32 = vector.broadcast %c112_i32 : i32 to vector<128x1xi32>
    %33 = arith.cmpi sge, %6, %32 : vector<128x1xi32>
    %34 = arith.extui %33 : vector<128x1xi1> to vector<128x1xi32>
    %35 = arith.addi %31, %34 : vector<128x1xi32>
    %c16_i32_0 = arith.constant 16 : i32
    %36 = vector.broadcast %c16_i32_0 : i32 to vector<128x1xi32>
    %37 = arith.muli %35, %36 : vector<128x1xi32>
    %38 = arith.subi %6, %37 : vector<128x1xi32>
    %39 = arith.sitofp %38 : vector<128x1xi32> to vector<128x1xf32>
    %40 = arith.sitofp %35 : vector<128x1xi32> to vector<128x1xf32>
    %cst = arith.constant 2.500000e-01 : f32
    %c0_i32_1 = arith.constant 0 : i32
    %c9_i32 = arith.constant 9 : i32
    %41 = arith.addi %c0_i32_1, %c9_i32 : i32
    %c1_i32 = arith.constant 1 : i32
    scf.for %arg9 = %c0_i32_1 to %41 step %c1_i32  : i32 {
      %c0 = arith.constant 0 : index
      %42 = arith.index_cast %arg9 : i32 to index
      %c0_3 = arith.constant 0 : index
      %43 = vector.load %arg6[%c0, %42, %c0_3] : memref<1x9x128xf32, #tpu.memory_space<vmem>>, vector<1x1x128xf32>
      %44 = vector.shape_cast %43 : vector<1x1x128xf32> to vector<1x128xf32>
      %c0_4 = arith.constant 0 : index
      %45 = arith.index_cast %arg9 : i32 to index
      %c0_5 = arith.constant 0 : index
      %46 = vector.load %arg7[%c0_4, %45, %c0_5] : memref<1x9x128xf32, #tpu.memory_space<vmem>>, vector<1x1x128xf32>
      %47 = vector.shape_cast %46 : vector<1x1x128xf32> to vector<1x128xf32>
      %c1_i32_6 = arith.constant 1 : i32
      %48 = arith.addi %5, %c1_i32_6 : i32
      %cst_7 = arith.constant 0.000000e+00 : f32
      %49 = vector.broadcast %cst_7 : f32 to vector<1x128xf32>
      %50 = arith.subi %48, %3 : i32
      %51 = arith.addi %3, %50 : i32
      %c1_i32_8 = arith.constant 1 : i32
      %52 = scf.for %arg10 = %3 to %51 step %c1_i32_8 iter_args(%arg11 = %49) -> (vector<1x128xf32>)  : i32 {
        %c8_i32 = arith.constant 8 : i32
        %59 = arith.muli %arg10, %c8_i32 : i32
        %60 = arith.sitofp %59 : i32 to f32
        %61 = vector.broadcast %60 : f32 to vector<128x1xf32>
        %62 = arith.addf %40, %61 : vector<128x1xf32>
        %63 = vector.broadcast %39 : vector<128x1xf32> to vector<128x128xf32>
        %64 = vector.broadcast %44 : vector<1x128xf32> to vector<128x128xf32>
        %65 = arith.subf %63, %64 : vector<128x128xf32>
        %66 = math.absf %65 : vector<128x128xf32>
        %cst_11 = arith.constant 1.000000e+00 : f32
        %67 = vector.broadcast %cst_11 : f32 to vector<128x128xf32>
        %68 = arith.subf %67, %66 : vector<128x128xf32>
        %cst_12 = arith.constant 0.000000e+00 : f32
        %69 = vector.broadcast %cst_12 : f32 to vector<128x128xf32>
        %70 = arith.maximumf %68, %69 : vector<128x128xf32>
        %71 = vector.broadcast %62 : vector<128x1xf32> to vector<128x128xf32>
        %72 = vector.broadcast %47 : vector<1x128xf32> to vector<128x128xf32>
        %73 = arith.subf %71, %72 : vector<128x128xf32>
        %74 = math.absf %73 : vector<128x128xf32>
        %cst_13 = arith.constant 1.000000e+00 : f32
        %75 = vector.broadcast %cst_13 : f32 to vector<128x128xf32>
        %76 = arith.subf %75, %74 : vector<128x128xf32>
        %cst_14 = arith.constant 0.000000e+00 : f32
        %77 = vector.broadcast %cst_14 : f32 to vector<128x128xf32>
        %78 = arith.maximumf %76, %77 : vector<128x128xf32>
        %79 = arith.mulf %70, %78 : vector<128x128xf32>
        %c0_15 = arith.constant 0 : index
        %80 = arith.index_cast %arg10 : i32 to index
        %c0_16 = arith.constant 0 : index
        %c0_17 = arith.constant 0 : index
        %81 = vector.load %arg5[%c0_15, %80, %c0_16, %c0_17] : memref<1x2x4x128xf32, #tpu.memory_space<vmem>>, vector<1x1x4x128xf32>
        %82 = vector.shape_cast %81 : vector<1x1x4x128xf32> to vector<4x128xf32>
        %cst_18 = arith.constant dense<0.000000e+00> : vector<4x128xf32>
        %83 = tpu.matmul %82, %79, %cst_18 {dimension_numbers = #tpu.dot_dimension_numbers<[1], [0], [0], [1], [0, 0, 1, 1], [], []>} : vector<4x128xf32>, vector<128x128xf32>, vector<4x128xf32> -> vector<4x128xf32>
        %c0_19 = arith.constant 0 : index
        %c0_20 = arith.constant 0 : index
        %c0_21 = arith.constant 0 : index
        %84 = vector.load %arg4[%c0_19, %c0_20, %c0_21] : memref<1x4x128xf32, #tpu.memory_space<vmem>>, vector<1x4x128xf32>
        %85 = vector.shape_cast %84 : vector<1x4x128xf32> to vector<4x128xf32>
        %86 = arith.mulf %85, %83 : vector<4x128xf32>
        %cst_22 = arith.constant dense<0.000000e+00> : vector<128xf32>
        %87 = vector.multi_reduction <add>, %86, %cst_22 [0] : vector<4x128xf32> to vector<128xf32>
        %88 = vector.shape_cast %87 : vector<128xf32> to vector<1x128xf32>
        %89 = arith.addf %arg11, %88 : vector<1x128xf32>
        scf.yield %89 : vector<1x128xf32>
      }
      %53 = vector.broadcast %cst : f32 to vector<1x128xf32>
      %54 = arith.mulf %52, %53 : vector<1x128xf32>
      %c0_9 = arith.constant 0 : index
      %55 = arith.index_cast %arg9 : i32 to index
      %c0_10 = arith.constant 0 : index
      %56 = vector.load %arg8[%c0_9, %55, %c0_10] : memref<1x9x128xf32, #tpu.memory_space<vmem>>, vector<1x1x128xf32>
      %57 = vector.shape_cast %56 : vector<1x1x128xf32> to vector<1x128xf32>
      %58 = vector.shape_cast %54 : vector<1x128xf32> to vector<1x1x128xf32>
      tpu.vector_store %arg8[%c0_9, %55, %c0_10], %58 {strides = array<i32>} : memref<1x9x128xf32, #tpu.memory_space<vmem>>, vector<1x1x128xf32>,
    }
    %c9_i32_2 = arith.constant 9 : i32
    return
  }
  func.func @transform_0(%arg0: i32, %arg1: i32, %arg2: memref<4xi32, #tpu.memory_space<smem>>, %arg3: memref<4xi32, #tpu.memory_space<smem>>) -> (i32, i32, i32) {
    %c0_i32 = arith.constant 0 : i32
    %c0_i32_0 = arith.constant 0 : i32
    return %arg0, %c0_i32, %arg1 : i32, i32, i32
  }
  func.func @transform_1(%arg0: i32, %arg1: i32, %arg2: memref<4xi32, #tpu.memory_space<smem>>, %arg3: memref<4xi32, #tpu.memory_space<smem>>) -> (i32, i32, i32, i32) {
    %c0_i32 = arith.constant 0 : i32
    %c0_i32_0 = arith.constant 0 : i32
    %c0_i32_1 = arith.constant 0 : i32
    %c0_i32_2 = arith.constant 0 : i32
    return %arg0, %c0_i32, %c0_i32_0, %c0_i32_1 : i32, i32, i32, i32
  }
  func.func @transform_2(%arg0: i32, %arg1: i32, %arg2: memref<4xi32, #tpu.memory_space<smem>>, %arg3: memref<4xi32, #tpu.memory_space<smem>>) -> (i32, i32, i32) {
    %c0_i32 = arith.constant 0 : i32
    %c0_i32_0 = arith.constant 0 : i32
    return %arg0, %c0_i32, %arg1 : i32, i32, i32
  }
  func.func @transform_3(%arg0: i32, %arg1: i32, %arg2: memref<4xi32, #tpu.memory_space<smem>>, %arg3: memref<4xi32, #tpu.memory_space<smem>>) -> (i32, i32, i32) {
    %c0_i32 = arith.constant 0 : i32
    %c0_i32_0 = arith.constant 0 : i32
    return %arg0, %c0_i32, %arg1 : i32, i32, i32
  }
  func.func @transform_4(%arg0: i32, %arg1: i32, %arg2: memref<4xi32, #tpu.memory_space<smem>>, %arg3: memref<4xi32, #tpu.memory_space<smem>>) -> (i32, i32, i32) {
    %c0_i32 = arith.constant 0 : i32
    %c0_i32_0 = arith.constant 0 : i32
    return %arg0, %c0_i32, %arg1 : i32, i32, i32
  }
}

</mosaic_0001>

<bundles_post_ra>
// kernel: tpu_custom_call.1
= control target key start
LH: loop header
LB: loop body
LE: loop exit
PB: predicated region body
PF: predicated region fallthrough
CT: control target
= control target key end

     0   :  { %s1436_s27 = smov [#allocation3]   ;;  %s1437_s28 = smov [#allocation4]   ;;  %s1805_s0 = inlined_call_operand.vmem [shape: s32[4], index: 0, kind: input, shape index: {}]   ;;  %s1806_s2 = inlined_call_operand.vmem [shape: f32[2,4,256], index: 2, kind: input, shape index: {}]   ;;  %s1807_s3 = inlined_call_operand.vmem [shape: f32[2,2,4,128], index: 3, kind: input, shape index: {}]   ;;  %s1808_s4 = inlined_call_operand.vmem [shape: f32[2,9,256], index: 4, kind: input, shape index: {}]   ;;  %s1809_s5 = inlined_call_operand.vmem [shape: f32[2,9,256], index: 5, kind: input, shape index: {}]   ;;  %s1810_s6 = inlined_call_operand.vmem [shape: f32[2,9,256], index: 6, kind: output, shape index: {}]   ;;  %s1811_s1 = inlined_call_operand.vmem [shape: s32[4], index: 1, kind: input, shape index: {}]  }
   0x1   :  { %s12_s23 = sshll.u32 %s1805_s0, 4  ;;  %s17_s26 = sshll.u32 %s1811_s1, 4  ;;  %s13_s23 = int_to_ptr.vmem [resolvable:$true] %s12_s23  ;;  %s18_s26 = int_to_ptr.vmem [resolvable:$true] %s17_s26 }
   0x2   :  { %15 = dma.vmem_to_smem %s13_s23, 16, %s1436_s27, [#allocation2] }
   0x3   :  { %20 = dma.vmem_to_smem %s18_s26, 16, %s1437_s28, [#allocation2] }
   0x4   :  { %1390 = dma.done.wait [#allocation2], 32 }
   0x5   :  { %1391 = vsyncadd [#allocation2], 4294967264 }
   0x6   :  { %23 = sfence }
   0x7   :  { %s1479_s29 = smov 0   ;;  %s1481_s30 = smov 0  }
   0x8   :  { %s1483_s7 = smov 0   ;;  %s1485_s0 = smov 0  }
   0x9   :  { %s1487_s8 = smov 0   ;;  %s1489_s1 = smov 0  }
   0xa   :  { %s1491_s9 = smov 0  }
   0xb LB: > { %s38_s10 = sadd.s32 1, %s1410_s8  ;;  %s41_s11 = sadd.s32 1, %s1414_s1  ;;  %s1418_s9 = sphi %s1491_s9, %s29_s9   ;;  %s1414_s1 = sphi %s1489_s1, %s1827_s1   ;;  %s1410_s8 = sphi %s1487_s8, %s1826_s8   ;;  %s1406_s0 = sphi %s1485_s0, %s1825_s0   ;;  %s1402_s7 = sphi %s1483_s7, %s1824_s7   ;;  %s1398_s30 = sphi %s1481_s30, %s1823_s30   ;;  %s1394_s29 = sphi %s1479_s29, %s1822_s29  }
   0xc   : > { %p39_p0 = scmp.ge.s32.totalorder %s38_s10, 2  ;;  %s1191_s12 = sadd.s32 4294967295, %s1418_s9  }
   0xd   : > { %p111_p1 = scmp.ne.s32.totalorder %s1398_s30, %s1394_s29  ;;  %p112_p2 = scmp.eq.s32.totalorder %s1418_s9, 0 }
   0xe   : > { %s1829_s10 = smov (%p39_p0, %s38_s10), 0  ;;  %s1831_s11 = smov (!%p39_p0, %s41_s11), %s1414_s1 }
   0xf   : > { %p43_p3 = scmp.ge.s32.totalorder %s1831_s11, 2  ;;  %p171_p4 = scmp.eq.s32.totalorder %s1191_s12, 3 }
  0x10   : > { %s100_s13 = ssub.s32 %s1410_s8, %s1829_s10  ;;  %p1525_p5 = por %p112_p2, %p111_p1 }
  0x11   : > { %s1833_s11 = smov (%p43_p3, %s1831_s11), 0  ;;  %p1531_p6 = por %p171_p4, %p111_p1 }
  0x12   : > { %s99_s16 = ssub.s32 %s1414_s1, %s1833_s11  ;;  %s104_s18 = sadd.s32 1, %s1398_s30 }
  0x13   : > { %s101_s17 = sor.u32 %s100_s13, %s99_s16  ;;  %p1194_p8 = scmp.ge.s32.totalorder %s1418_s9, 4 }
  0x14   : > { %p102_p7 = scmp.eq.s32.totalorder %s101_s17, 0 }
  0x15   : > { %193 = sbr.rel (%p1194_p8) target bundleno = 42 (0x2a), region = 16 }
  0x16   : > { %s1539_s19 = scalar_select %p102_p7, %s1398_s30, %s104_s18  }
  0x1a   : > { %215 = sbr.rel (!%p1525_p5) target bundleno = 34 (0x22), region = 28  ;;  %s217_s20 = sand.u32 (%p1525_p5), 1, %s1398_s30  }
  0x1b   : > { %s1196_s21 = sshll.u32 (%p1525_p5), %s1414_s1, 2  ;;  %s1195_s22 = sshll.u32 (%p1525_p5), %s217_s20, 4 }
  0x1c   : > { %s221_s23 = sadd.s32 (%p1525_p5), %s1410_s8, %s1196_s21  ;;  %s219_s28 = scalar_lea.vmem (%p1525_p5), [#allocation5], %s1195_s22 }
  0x1d   : > { %s1197_s24 = sshll.u32 (%p1525_p5), %s221_s23, 3 }
  0x1e   : > { %s223_s27 = scalar_lea.vmem (%p1525_p5), %s1808_s4, %s1197_s24 }
  0x1f   : > { %v254_v0 = vld [vmem:[%s223_s27] sm:$0xff]  ;;  %v256_v1 = vld [vmem:[%s223_s27 + $0x10] sm:$0xff] }
  0x20   : > { %255 = vst [vmem:[%s219_s28] sm:$0xff] %v254_v0 }
  0x21   : > { %257 = vst [vmem:[%s219_s28 + $0x8] sm:$0xff] %v256_v1 }
  0x22 PF: > { %263 = sbr.rel (!%p1525_p5) target bundleno = 42 (0x2a), region = 66  ;;  %s265_s12 = sand.u32 (%p1525_p5), 1, %s1398_s30  }
  0x23   : > { %s1199_s13 = sshll.u32 (%p1525_p5), %s1414_s1, 2  ;;  %s1198_s16 = sshll.u32 (%p1525_p5), %s265_s12, 4 }
  0x24   : > { %s269_s17 = sadd.s32 (%p1525_p5), %s1410_s8, %s1199_s13  ;;  %s267_s22 = scalar_lea.vmem (%p1525_p5), [#allocation6], %s1198_s16 }
  0x25   : > { %s1200_s18 = sshll.u32 (%p1525_p5), %s269_s17, 3 }
  0x26   : > { %s271_s23 = scalar_lea.vmem (%p1525_p5), %s1809_s5, %s1200_s18 }
  0x27   : > { %v302_v2 = vld [vmem:[%s271_s23] sm:$0xff]  ;;  %v304_v3 = vld [vmem:[%s271_s23 + $0x10] sm:$0xff] }
  0x28   : > { %303 = vst [vmem:[%s267_s22] sm:$0xff] %v302_v2 }
  0x29   : > { %305 = vst [vmem:[%s267_s22 + $0x8] sm:$0xff] %v304_v3 }
  0x2a PF: > { %p1201_p9 = scmp.ge.s32.totalorder %s1418_s9, 1  ;;  %p310_p10 = scmp.lt.s32.totalorder %s1418_s9, 5 }
  0x2c   : > { %p311_p11 = pnand %p1201_p9, %p310_p10 }
  0x2d   : > { %s317_s14 = sand.u32 (!%p311_p11), 1, %s1394_s29   ;;  %p365_p12 = scmp.lt.s32.totalorder (!%p311_p11), %s1406_s0, 1 }
  0x2e   : > { %314 = sbr.rel (%p311_p11) target bundleno = 279 (0x117), region = 104  ;;  %s1562_s24 = sshll.u32 (!%p311_p11), %s317_s14, 4 }
  0x2f   : > { %p367_p13 = scmp.lt.s32.totalorder (!%p311_p11), %s1402_s7, 1  ;;  %s1209_s25 = sshll.u32 (!%p311_p11), %s1406_s0, 1 }
  0x30   : > { %s379_s20 = sadd.s32 (!%p311_p11), %s1402_s7, %s1209_s25 }
  0x31   : > { %s1608_s14 = sld [smem:[#allocation3 + %s379_s20]] (!%p311_p11)  }
  0x32   : > { %s1618_s25 = sld [smem:[#allocation4 + %s379_s20]] (!%p311_p11) }
  0x33   : > { %v382_v4 = vlaneseq  ;;  %s366_s26 = scalar_select %p365_p12, %s1406_s0, 1 }
  0x34   : > { %s368_s27 = scalar_select %p367_p13, %s1402_s7, 1 }
  0x35   : > { %v1565_v5 = vshrl.u32 %v382_v4, 7  ;;  %s1205_s29 = sshll.u32 %s366_s26, 1  ;;  %s1231_s28 = sshll.u32 %s366_s26, 3 }
  0x36   : > { %s370_s12 = sadd.s32 %s1205_s29, %s368_s27  ;;  %s1587_s17 = scalar_lea.vmem %s1807_s3, %s1231_s28 }
  0x37   : > { %v1570_v6 = vadd.s32 8, %v1565_v5  ;;  %v385_v7 = vadd.s32 16, %v1565_v5  ;;  %v386_v8 = vadd.s32 24, %v1565_v5  ;;  %v387_v9 = vadd.s32 32, %v1565_v5  ;;  %s1206_s18 = sshll.u32 %s370_s12, 2  ;;  %s319_s26 = scalar_lea.vmem [#allocation5], %s1562_s24 }
  0x38   : > { %v388_v10 = vadd.s32 40, %v1565_v5  ;;  %v389_v11 = vadd.s32 48, %v1565_v5  ;;  %v390_v12 = vadd.s32 56, %v1565_v5  ;;  %v391_v13 = vadd.s32 64, %v1565_v5  ;;  %s1606_s22 = scalar_lea.vmem %s1806_s2, %s1206_s18  ;;  %s326_s27 = scalar_lea.vmem [#allocation6], %s1562_s24 }
  0x39   : > { %v392_v14 = vadd.s32 72, %v1565_v5  ;;  %v393_v15 = vadd.s32 80, %v1565_v5  ;;  %v394_v16 = vadd.s32 88, %v1565_v5  ;;  %v395_v17 = vadd.s32 96, %v1565_v5  ;;  %s1649_s29 = scalar_lea.vmem [#allocation7], %s1562_s24  ;;  %s1651_s28 = smov 0  }
  0x3a   : > { %v396_v18 = vadd.s32 104, %v1565_v5  ;;  %v397_v19 = vadd.s32 112, %v1565_v5  ;;  %v398_v20 = vadd.s32 120, %v1565_v5  ;;  %v1592_v21 = vadd.s32 4294967280, %v385_v7 }
  0x3b   : > { %v1595_v22 = vadd.s32 4294967280, %v386_v8  ;;  %v1597_v23 = vadd.s32 4294967264, %v387_v9  ;;  %v1599_v24 = vadd.s32 4294967264, %v388_v10  ;;  %v1601_v25 = vadd.s32 4294967248, %v389_v11 }
  0x3c   : > { %v1610_v26 = vadd.s32 4294967248, %v390_v12  ;;  %v1612_v27 = vadd.s32 4294967232, %v391_v13  ;;  %v1614_v28 = vadd.s32 4294967232, %v392_v14  ;;  %v1616_v29 = vadd.s32 4294967216, %v393_v15 }
  0x3d   : > { %v1620_v30 = vadd.s32 4294967216, %v394_v16  ;;  %v1622_v31 = vadd.s32 4294967200, %v395_v17  ;;  %v1624_v32 = vadd.s32 4294967200, %v396_v18  ;;  %v1626_v33 = vadd.s32 4294967184, %v397_v19 }
  0x3e   : > { %v1628_v34 = vadd.s32 4294967184, %v398_v20  ;;  %v751_v35 = vcvt.s32.f32 %v1565_v5  ;;  %v752_v36 = vcvt.s32.f32 %v1570_v6  ;;  %v753_v37 = vcvt.s32.f32 %v1592_v21 }
  0x3f   : > { %v754_v38 = vcvt.s32.f32 %v1595_v22  ;;  %v755_v39 = vcvt.s32.f32 %v1597_v23  ;;  %v756_v40 = vcvt.s32.f32 %v1599_v24  ;;  %v757_v41 = vcvt.s32.f32 %v1601_v25 }
  0x40   : > { %v763_v47 = vcvt.s32.f32 %v1622_v31  ;;  %v764_v48 = vcvt.s32.f32 %v1624_v32  ;;  %v765_v49 = vcvt.s32.f32 %v1626_v33  ;;  %v766_v50 = vcvt.s32.f32 %v1628_v34 }
  0x41 LB: >> { %s793_s12 = sadd.s32 1, %s1618_s25  ;;  %s789_s13 = scalar_lea.vmem %s319_s26, %s1422_s28 [#allocation5]  ;;  %v1670_v53 = vmov 0.0   ;;  %s1422_s28 = sphi %s1651_s28, %s788_s28  }
  0x42   : >> { %s791_s16 = scalar_lea.vmem %s326_s27, %s1422_s28 [#allocation6]  ;;  %v1663_v51 = vld [vmem:[%s789_s13] sm:$0x1]  ;;  %p1129_p0 = scmp.ge.s32.totalorder %s1608_s14, %s793_s12 }
  0x43   : >> { %v1665_v52 = vld [vmem:[%s791_s16] sm:$0x1]  ;;  %s1814_s18 = smov (!%p1129_p0), %s1608_s14 }
  0x44   : >> { %1131 = sbr.rel (%p1129_p0) target bundleno = 265 (0x109), region = 211 }
  0x49   : >> { %v1672_v54 = vmov 0.0  }
  0x4a LB: >>> { %v1684_v55 = vperm.slane %v1663_v51, 0  ;;  %s1224_s20 = sshll.u32 %s1430_s18, 3  ;;  %v1700_v61 = vperm.slane %v1665_v52, 0  ;;  %v1815_v46 = vcvt.s32.f32 %v1620_v30  ;;  %v1816_v45 = vcvt.s32.f32 %v1616_v29  ;;  %s1225_s23 = sshll.u32 %s1430_s18, 2  ;;  %s1430_s18 = sphi %s1814_s18, %s797_s18   ;;  %v1426_v54 = vphi %v1672_v54, %v1820_v54  }
  0x4b   : >>> { %s802_s21 = scvt.s32.f32 %s1224_s20  ;;  %v1817_v44 = vcvt.s32.f32 %v1614_v28  ;;  %v1818_v43 = vcvt.s32.f32 %v1612_v27  ;;  %v1819_v42 = vcvt.s32.f32 %v1610_v26  ;;  %s967_s13 = scalar_lea.vmem %s1587_s17, %s1225_s23  ;;  %vm991_vm0 = vcmask 1043456  }
  0x4c   : >>> { %v836_v56 = vsub.f32 %v766_v50, %v1684_v55  ;;  %v835_v57 = vsub.f32 %v765_v49, %v1684_v55  ;;  %v834_v58 = vsub.f32 %v764_v48, %v1684_v55  ;;  %v833_v59 = vsub.f32 %v763_v47, %v1684_v55  ;;  %s797_s18 = sadd.s32 1, %s1430_s18  }
  0x4d   : >>> { %v1702_v63 = vstv %s802_s21  ;;  %v832_v0 = vsub.f32 %v1815_v46, %v1684_v55  ;;  %v831_v1 = vsub.f32 %v1816_v45, %v1684_v55  ;;  %v830_v10 = vsub.f32 %v1817_v44, %v1684_v55  ;;  %p796_p1 = scmp.ge.s32.totalorder %s797_s18, %s793_s12 }
  0x4e   : >>> { %v852_v60 = vand.u32 2147483647, %v836_v56  ;;  %v851_v62 = vand.u32 2147483647, %v835_v57  ;;  %v818_v2 = vadd.f32 7.0, %v1702_v63  ;;  %v816_v3 = vadd.f32 6.0, %v1702_v63 }
  0x4f   : >>> { %v850_v4 = vand.u32 2147483647, %v834_v58  ;;  %v849_v8 = vand.u32 2147483647, %v833_v59  ;;  %v814_v9 = vadd.f32 5.0, %v1702_v63  ;;  %v829_v14 = vsub.f32 %v1818_v43, %v1684_v55 }
  0x50   : >>> { %v868_v7 = vsub.f32 1.0, %v852_v60  ;;  %v900_v11 = vsub.f32 %v818_v2, %v1700_v61  ;;  %v867_v12 = vsub.f32 1.0, %v851_v62  ;;  %v898_v13 = vsub.f32 %v816_v3, %v1700_v61 }
  0x51   : >>> { %v848_v15 = vand.u32 2147483647, %v832_v0  ;;  %v896_v16 = vsub.f32 %v814_v9, %v1700_v61  ;;  %v847_v17 = vand.u32 2147483647, %v831_v1  ;;  %v828_v18 = vsub.f32 %v1819_v42, %v1684_v55 }
  0x52   : >>> { %v916_v19 = vand.u32 2147483647, %v900_v11  ;;  %v866_v20 = vsub.f32 1.0, %v850_v4  ;;  %v914_v53 = vand.u32 2147483647, %v898_v13  ;;  %v812_v56 = vadd.f32 4.0, %v1702_v63 }
  0x53   : >>> { %v884_v57 = vmax.f32 %v868_v7, 0.0  ;;  %v865_v58 = vsub.f32 1.0, %v849_v8  ;;  %v912_v59 = vand.u32 2147483647, %v896_v16  ;;  %v846_v60 = vand.u32 2147483647, %v830_v10 }
  0x54   : >>> { %v932_v62 = vsub.f32 1.0, %v916_v19  ;;  %v883_v2 = vmax.f32 %v867_v12, 0.0  ;;  %v930_v3 = vsub.f32 1.0, %v914_v53  ;;  %v894_v0 = vsub.f32 %v812_v56, %v1700_v61 }
  0x55   : >>> { %v864_v9 = vsub.f32 1.0, %v848_v15  ;;  %v928_v1 = vsub.f32 1.0, %v912_v59  ;;  %v863_v43 = vsub.f32 1.0, %v847_v17  ;;  %v810_v44 = vadd.f32 3.0, %v1702_v63 }
  0x56   : >>> { %v948_v42 = vmax.f32 %v932_v62, 0.0  ;;  %v882_v11 = vmax.f32 %v866_v20, 0.0  ;;  %v946_v4 = vmax.f32 %v930_v3, 0.0  ;;  %v910_v13 = vand.u32 2147483647, %v894_v0 }
  0x57   : >>> { %v881_v45 = vmax.f32 %v865_v58, 0.0  ;;  %v862_v46 = vsub.f32 1.0, %v846_v60  ;;  %v845_v7 = vand.u32 2147483647, %v829_v14  ;;  %v892_v8 = vsub.f32 %v810_v44, %v1700_v61 }
  0x58   : >>> { %v965_v10 = vmul.f32 %v948_v42, %v884_v57  ;;  %v964_v16 = vmul.f32 %v948_v42, %v883_v2  ;;  %v844_v12 = vand.u32 2147483647, %v828_v18  ;;  %v827_v15 = vsub.f32 %v757_v41, %v1684_v55 }
  0x59   : >>> { %v880_v19 = vmax.f32 %v864_v9, 0.0  ;;  %v944_v17 = vmax.f32 %v928_v1, 0.0  ;;  %v879_v53 = vmax.f32 %v863_v43, 0.0  ;;  %v926_v56 = vsub.f32 1.0, %v910_v13 }
  0x5a   : >>> { %969 = vmatpush.msra.mxu0 %v965_v10  ;;  %v963_v20 = vmul.f32 %v946_v4, %v882_v11  ;;  %v908_v59 = vand.u32 2147483647, %v892_v8  ;;  %v808_v58 = vadd.f32 2.0, %v1702_v63  ;;  %v826_v44 = vsub.f32 %v756_v40, %v1684_v55 }
  0x5b   : >>> { %v962_v14 = vmul.f32 %v946_v4, %v881_v45  ;;  %v878_v42 = vmax.f32 %v862_v46, 0.0  ;;  %v861_v18 = vsub.f32 1.0, %v845_v7  ;;  %v806_v57 = vadd.f32 1.0, %v1702_v63 }
  0x5c   : >>> { %970 = vmatpush.msra.mxu0 %v964_v16  ;;  %v860_v60 = vsub.f32 1.0, %v844_v12  ;;  %v843_v62 = vand.u32 2147483647, %v827_v15  ;;  %v890_v43 = vsub.f32 %v808_v58, %v1700_v61  ;;  %v825_v2 = vsub.f32 %v755_v39, %v1684_v55 }
  0x5d   : >>> { %v942_v3 = vmax.f32 %v926_v56, 0.0  ;;  %v924_v0 = vsub.f32 1.0, %v908_v59  ;;  %v842_v9 = vand.u32 2147483647, %v826_v44  ;;  %v824_v45 = vsub.f32 %v754_v38, %v1684_v55 }
  0x5e   : >>> { %971 = vmatpush.msra.mxu0 %v963_v20  ;;  %v961_v46 = vmul.f32 %v944_v17, %v880_v19  ;;  %v906_v1 = vand.u32 2147483647, %v890_v43  ;;  %v960_v11 = vmul.f32 %v944_v17, %v879_v53  ;;  %v877_v4 = vmax.f32 %v861_v18, 0.0 }
  0x5f   : >>> { %v888_v13 = vsub.f32 %v806_v57, %v1700_v61  ;;  %v876_v7 = vmax.f32 %v860_v60, 0.0  ;;  %v859_v8 = vsub.f32 1.0, %v843_v62  ;;  %v841_v10 = vand.u32 2147483647, %v825_v2 }
  0x60   : >>> { %972 = vmatpush.msra.mxu0 %v962_v14  ;;  %v823_v16 = vsub.f32 %v753_v37, %v1684_v55  ;;  %v959_v12 = vmul.f32 %v942_v3, %v878_v42  ;;  %v940_v15 = vmax.f32 %v924_v0, 0.0  ;;  %v858_v56 = vsub.f32 1.0, %v842_v9 }
  0x61   : >>> { %v840_v59 = vand.u32 2147483647, %v824_v45  ;;  %v922_v20 = vsub.f32 1.0, %v906_v1  ;;  %v904_v19 = vand.u32 2147483647, %v888_v13  ;;  %v822_v17 = vsub.f32 %v752_v36, %v1684_v55 }
  0x62   : >>> { %973 = vmatpush.msra.mxu0 %v961_v46  ;;  %v886_v53 = vsub.f32 %v1702_v63, %v1700_v61  ;;  %v958_v58 = vmul.f32 %v942_v3, %v877_v4  ;;  %v875_v44 = vmax.f32 %v859_v8, 0.0  ;;  %v857_v14 = vsub.f32 1.0, %v841_v10 }
  0x63   : >>> { %v839_v18 = vand.u32 2147483647, %v823_v16  ;;  %v821_v42 = vsub.f32 %v751_v35, %v1684_v55  ;;  %v957_v57 = vmul.f32 %v940_v15, %v876_v7  ;;  %v874_v60 = vmax.f32 %v858_v56, 0.0 }
  0x64   : >>> { %974 = vmatpush.msra.mxu0 %v960_v11  ;;  %v856_v62 = vsub.f32 1.0, %v840_v59  ;;  %v938_v43 = vmax.f32 %v922_v20, 0.0  ;;  %v920_v2 = vsub.f32 1.0, %v904_v19  ;;  %v838_v0 = vand.u32 2147483647, %v822_v17 }
  0x65   : >>> { %v902_v9 = vand.u32 2147483647, %v886_v53  ;;  %v956_v45 = vmul.f32 %v940_v15, %v875_v44  ;;  %v873_v61 = vmax.f32 %v857_v14, 0.0  ;;  %v855_v63 = vsub.f32 1.0, %v839_v18  ;;  %v968_v19 = vld [vmem:[%s967_s13] sm:$0xf] }
  0x66   : >>> { %975 = vmatpush.msra.mxu0 %v959_v12  ;;  %v837_v3 = vand.u32 2147483647, %v821_v42  ;;  %v872_v46 = vmax.f32 %v856_v62, 0.0  ;;  %v955_v1 = vmul.f32 %v938_v43, %v874_v60  ;;  %v936_v11 = vmax.f32 %v920_v2, 0.0  ;;  %v989_v17 = vld [vmem:[%s1606_s22] sm:$0xf] }
  0x67   : >>> { %v854_v4 = vsub.f32 1.0, %v838_v0  ;;  %v918_v55 = vsub.f32 1.0, %v902_v9  ;;  %v954_v13 = vmul.f32 %v938_v43, %v873_v61  ;;  %v871_v7 = vmax.f32 %v855_v63, 0.0 }
  0x68   : >>> { %976 = vmatpush.msra.mxu0 %v958_v58  ;;  %v853_v8 = vsub.f32 1.0, %v837_v3  ;;  %v953_v10 = vmul.f32 %v936_v11, %v872_v46 }
  0x69   : >>> { %v870_v16 = vmax.f32 %v854_v4, 0.0  ;;  %v934_v12 = vmax.f32 %v918_v55, 0.0  ;;  %v952_v15 = vmul.f32 %v936_v11, %v871_v7 }
  0x6a   : >>> { %977 = vmatpush.msra.mxu0 %v957_v57  ;;  %v869_v56 = vmax.f32 %v853_v8, 0.0 }
  0x6b   : >>> { %v951_v59 = vmul.f32 %v934_v12, %v870_v16 }
  0x6c   : >>> { %978 = vmatpush.msra.mxu0 %v956_v45  ;;  %v950_v20 = vmul.f32 %v934_v12, %v869_v56 }
  0x6e   : >>> { %979 = vmatpush.msra.mxu0 %v955_v1 }
  0x70   : >>> { %980 = vmatpush.msra.mxu0 %v954_v13 }
  0x72   : >>> { %981 = vmatpush.msra.mxu0 %v953_v10 }
  0x74   : >>> { %982 = vmatpush.msra.mxu0 %v952_v15 }
  0x76   : >>> { %983 = vmatpush.msra.mxu0 %v951_v59 }
  0x78   : >>> { %984 = vmatpush.msra.mxu0 %v950_v20 }
  0x79   : >>> { %985 = vmatmul.f32.vlgmr.msra.gmra.mxu0 %v968_v19 }
  0xf6   : >>> { %v986_v53 = vpop.f32.mrf.mxu0 }
  0xf7   : >>> { %v990_v58 = vmul.f32 %v989_v17, %v986_v53 }
  0xf9   : >>> { %v992_v44 = vsel %vm991_vm0, %v990_v58, 0.0 }
  0xfa   : >>> { %v993_v14 = vrot.slane %v992_v44, 4 }
  0xfc   : >>> { %v994_v18 = vadd.f32 %v993_v14, %v992_v44 }
  0xfe   : >>> { %v995_v42 = vrot.slane %v994_v18, 2 }
 0x100   : >>> { %v996_v57 = vadd.f32 %v995_v42, %v994_v18 }
 0x102   : >>> { %v997_v60 = vrot.slane %v996_v57, 1 }
 0x104   : >>> { %v998_v62 = vadd.f32 %v997_v60, %v996_v57  ;;  %799 = sbr.rel (!%p796_p1) target bundleno = 74 (0x4a), region = 217 }
 0x106   : >>> { %v999_v43 = vadd.f32 %v1426_v54, %v998_v62  }
 0x108   : >>> { %v1820_v54 = vmov %v999_v43  ;;  %v1821_v53 = vmov (%p796_p1), %v999_v43 }
 0x109 PF: >> { %v1000_v2 = vmul.f32 0.25, %v1434_v53  ;;  %s1001_s16 = scalar_lea.vmem %s1649_s29, %s1422_s28 [#allocation7]  ;;  %s788_s28 = sadd.s32 1, %s1422_s28   ;;  %v1434_v53 = vphi %v1670_v53, %v1821_v53  }
 0x10a   : >> { %p785_p2 = scmp.ge.s32.totalorder %s788_s28, 9  }
 0x10b   : >> { %1002 = vst [vmem:[%s1001_s16] sm:$0x1] %v1000_v2 }
 0x10c   : > { %787 = sbr.rel (!%p785_p2) target bundleno = 65 (0x41), region = 228 }
 0x111   : > { %1009 = sbr.rel (!%p1531_p6) target bundleno = 279 (0x117), region = 130  ;;  %s1227_s12 = sshll.u32 (%p1531_p6), %s1406_s0, 2 }
 0x112   : > { %s1011_s18 = sadd.s32 (%p1531_p6), %s1402_s7, %s1227_s12  ;;  %v1044_v51 = vld [vmem:[%s1649_s29] sm:$0xff] (%p1531_p6)  ;;  %v1046_v52 = vld [vmem:[%s1649_s29 + $0x8] sm:$0xff] (%p1531_p6) }
 0x113   : > { %s1228_s20 = sshll.u32 (%p1531_p6), %s1011_s18, 3 }
 0x114   : > { %s1013_s13 = scalar_lea.vmem (%p1531_p6), %s1810_s6, %s1228_s20 }
 0x115   : > { %1045 = vst [vmem:[%s1013_s13] sm:$0xff] (%p1531_p6), %v1044_v51 }
 0x116   : > { %1047 = vst [vmem:[%s1013_s13 + $0x10] sm:$0xff] %v1046_v52 }
 0x117 PF: > { %s29_s9 = sadd.s32 1, %s1418_s9   ;;  %s1822_s29 = smov %s1398_s30 }
 0x118   : > { %p26_p3 = scmp.ge.s32.totalorder %s29_s9, 6   ;;  %s1823_s30 = smov %s1539_s19 }
 0x119   : > { %s1824_s7 = smov %s1410_s8  ;;  %s1825_s0 = smov %s1414_s1 }
 0x11a   : > { %s1826_s8 = smov %s1829_s10  ;;  %s1827_s1 = smov %s1833_s11 }
 0x11b   :  { %28 = sbr.rel (!%p26_p3) target bundleno = 11 (0xb), region = 239 }

</bundles_post_ra>
